<compile_context>
chip_gen: v7x
topology: tpu7x:2x2x1
jax: 0.10.0
libtpu: 0.0.40
codegen_flags: <defaults>
</compile_context>

<pallas_src>
import jax
import jax.numpy as jnp
from jax.experimental import pallas as pl
from jax.experimental.pallas import tpu as pltpu


def _round_up(x, m):
    return ((x + m - 1) // m) * m


def simple_mlp_kernel(pred_ref, join_ref, w1_ref, b1_ref, w2_ref, b2_ref,
                      wo1_ref, bo1_ref, wo2_ref, bo2_ref, out_ref):
    """One batch tile, transposed layout (batch on the lane axis). All math in f32.

    pred_ref : (Pp, TB) f32  predicate features, transposed, feature-padded to mult. of 8
    join_ref : (Jp, TB) f32  join features, transposed, feature-padded to mult. of 8
    w1_ref   : (2H, Pp+Jp)   blockdiag(Wp1, Wj1)   (PyTorch (out, in) convention)
    w2_ref   : (2H, 2H)      blockdiag(Wp2, Wj2)
    wo1_ref  : (H, 2H)       out_mlp1 weight exactly as PyTorch stores it
    wo2_ref  : (1, H)        out_mlp2 weight as a row (M=1 MXU dot, lane-dense result)
    b*_ref   : (., 1)        biases as columns (broadcast across lanes)
    out_ref  : (1, TB) f32   sigmoid output, lane-dense (unmasked stores)
    """
    relu = lambda v: jnp.maximum(v, 0.0)

    # Feature concat on the tiny in-VMEM tiles (no wrapper-side HBM concat round-trip).
    x = jnp.concatenate([pred_ref[...], join_ref[...]], axis=0)          # (F, TB)

    # predicate_mlp1 + join_mlp1, fused via block-diagonal weight
    h = relu(jnp.dot(w1_ref[...], x,
                     preferred_element_type=jnp.float32) + b1_ref[...])
    # predicate_mlp2 + join_mlp2, fused via block-diagonal weight
    h = relu(jnp.dot(w2_ref[...], h,
                     preferred_element_type=jnp.float32) + b2_ref[...])
    # out_mlp1 over the (already "concatenated") 2H activation rows
    h = relu(jnp.dot(wo1_ref[...], h,
                     preferred_element_type=jnp.float32) + bo1_ref[...])
    # out_mlp2 (H -> 1) as an M=1 MXU dot: keeps the VPU/XLU free and the output lane-dense.
    logits = jnp.dot(wo2_ref[...], h,
                     preferred_element_type=jnp.float32) + bo2_ref[...]  # (1, TB)
    out_ref[...] = jax.nn.sigmoid(logits)


def init_params(key, predicate_feats, join_feats, hid_units):
    """PyTorch nn.Linear default init: U(-1/sqrt(fan_in), +1/sqrt(fan_in)).
    Weights stored in PyTorch's (out_features, in_features) convention."""
    def linear(k, fan_in, fan_out):
        kw, kb = jax.random.split(k)
        bound = 1.0 / jnp.sqrt(jnp.float32(fan_in))
        w = jax.random.uniform(kw, (fan_out, fan_in), jnp.float32, -bound, bound)
        b = jax.random.uniform(kb, (fan_out,), jnp.float32, -bound, bound)
        return w, b

    keys = jax.random.split(key, 6)
    wp1, bp1 = linear(keys[0], predicate_feats, hid_units)
    wp2, bp2 = linear(keys[1], hid_units, hid_units)
    wj1, bj1 = linear(keys[2], join_feats, hid_units)
    wj2, bj2 = linear(keys[3], hid_units, hid_units)
    wo1, bo1 = linear(keys[4], 2 * hid_units, hid_units)
    wo2, bo2 = linear(keys[5], hid_units, 1)
    return dict(wp1=wp1, bp1=bp1, wp2=wp2, bp2=bp2,
                wj1=wj1, bj1=bj1, wj2=wj2, bj2=bj2,
                wo1=wo1, bo1=bo1, wo2=wo2, bo2=bo2)


def prepare_fused_params(p):
    """One-time wrapper-side fusion: block-diagonal layer weights + column biases (all f32).
    Feature axes padded to multiples of 8 (f32 sublane packing) with zero weight columns."""
    H, P = p["wp1"].shape
    J = p["wj1"].shape[1]
    Pp, Jp = _round_up(P, 8), _round_up(J, 8)

    wp1 = jnp.pad(p["wp1"], ((0, 0), (0, Pp - P)))
    wj1 = jnp.pad(p["wj1"], ((0, 0), (0, Jp - J)))
    z_pj = jnp.zeros((H, Jp), jnp.float32)
    z_jp = jnp.zeros((H, Pp), jnp.float32)
    z_hh = jnp.zeros((H, H), jnp.float32)

    w1_bd = jnp.concatenate([jnp.concatenate([wp1, z_pj], axis=1),
                             jnp.concatenate([z_jp, wj1], axis=1)], axis=0)       # (2H, Pp+Jp)
    w2_bd = jnp.concatenate([jnp.concatenate([p["wp2"], z_hh], axis=1),
                             jnp.concatenate([z_hh, p["wj2"]], axis=1)], axis=0)  # (2H, 2H)

    return dict(
        w1=w1_bd,
        b1=jnp.concatenate([p["bp1"], p["bj1"]]).reshape(2 * H, 1),
        w2=w2_bd,
        b2=jnp.concatenate([p["bp2"], p["bj2"]]).reshape(2 * H, 1),
        wo1=p["wo1"],                                # (H, 2H), matches the "concat" row order
        bo1=p["bo1"].reshape(H, 1),
        wo2=p["wo2"].reshape(1, H),                  # row vector for the M=1 MXU dot
        bo2=p["bo2"].reshape(1, 1),
        feat_pads=(P, Pp, J, Jp),
    )


def _pick_tile(batch, tb):
    """Clamp the requested lane tile to the batch and keep >=2 grid steps when possible
    so v7x's two TensorCores both get work from the 'parallel' axis."""
    assert tb % 128 == 0
    b_min = _round_up(batch, 128)          # smallest legal lane-padded batch
    tb_eff = min(tb, b_min)
    if b_min >= 256 and pl.cdiv(b_min, tb_eff) < 2:
        tb_eff = _round_up(pl.cdiv(batch, 2), 128)
    return tb_eff


def _vmem_limit_bytes(Pp, Jp, H, tb):
    """Explicit scoped-VMEM budget: generous headroom over actual use, never below the
    v5e 16 MiB scoped default, never near v7x's 64 MiB physical ceiling."""
    f32 = 4
    inputs = 2 * 2 * (Pp + Jp) * tb * f32                          # 2 inputs, double-buffered
    weights = 2 * (2 * H * (Pp + Jp) + 6 * H * H + H) * f32        # revisited blocks, 2 bufs
    biases = 2 * (5 * H + 1) * 128 * f32                           # lane-padded columns
    acts = 4 * (2 * H) * tb * f32                                  # f32 intermediates
    out = 2 * tb * f32
    est = inputs + weights + biases + acts + out
    return max(min(2 * est + (4 << 20), 48 << 20), 16 << 20)


def simple_mlp_forward(predicates, joins, fused, *, tb=1024):
    """Fused SimpleMLP forward.

    tb: batch tile on the lane axis (multiple of 128). 1024 is a good default; use
        2048-4096 for very large B. With production-sized features/hidden units,
        re-derive tb so (double-buffered inputs + f32 intermediates) stays well under
        v7x's 64 MiB VMEM (v5e/v6e have 128 MiB but smaller scoped defaults, which the
        explicit vmem_limit_bytes below covers).
    """
    B = predicates.shape[0]
    P, Pp, J, Jp = fused["feat_pads"]
    H = fused["wo1"].shape[0]

    tb_eff = _pick_tile(B, tb)
    num_tiles = pl.cdiv(B, tb_eff)
    b_pad = num_tiles * tb_eff

    # Wrapper-side layout plumbing is limited to one transpose+pad per input (no HBM-level
    # concat / dtype-cast round trips; the concat happens in-kernel, all math stays f32).
    pred_t = jnp.pad(predicates.T, ((0, Pp - P), (0, b_pad - B)))   # (Pp, b_pad)
    join_t = jnp.pad(joins.T, ((0, Jp - J), (0, b_pad - B)))        # (Jp, b_pad)

    # Constant index_map -> block stays VMEM-resident across grid steps (no re-DMA).
    # (For production H >= 256, pipeline_mode=pl.Buffered(1) on these specs would also
    #  drop the never-used second weight buffer; negligible at H=32 so left at default.)
    resident = lambda a: pl.BlockSpec(a.shape, lambda i: (0, 0))

    out = pl.pallas_call(
        simple_mlp_kernel,
        out_shape=jax.ShapeDtypeStruct((1, b_pad), jnp.float32),
        grid=(num_tiles,),
        in_specs=[
            pl.BlockSpec((Pp, tb_eff), lambda i: (0, i)),   # batch on lanes
            pl.BlockSpec((Jp, tb_eff), lambda i: (0, i)),
            resident(fused["w1"]), resident(fused["b1"]),
            resident(fused["w2"]), resident(fused["b2"]),
            resident(fused["wo1"]), resident(fused["bo1"]),
            resident(fused["wo2"]), resident(fused["bo2"]),
        ],
        out_specs=pl.BlockSpec((1, tb_eff), lambda i: (0, i)),      # lane-dense output slab
        compiler_params=pltpu.CompilerParams(
            dimension_semantics=("parallel",),              # v7x: shard batch over 2 TCs
            vmem_limit_bytes=_vmem_limit_bytes(Pp, Jp, H, tb_eff)),
    )(pred_t, join_t, fused["w1"], fused["b1"], fused["w2"], fused["b2"],
      fused["wo1"], fused["bo1"], fused["wo2"], fused["bo2"])

    return out.reshape(b_pad, 1)[:B]


def reference_forward(predicates, joins, p):
    """Pure-JAX f32 reference with exact PyTorch SimpleMLP semantics."""
    relu = lambda v: jnp.maximum(v, 0.0)
    hp = relu(predicates @ p["wp1"].T + p["bp1"])
    hp = relu(hp @ p["wp2"].T + p["bp2"])
    hj = relu(joins @ p["wj1"].T + p["bj1"])
    hj = relu(hj @ p["wj2"].T + p["bj2"])
    hid = relu(jnp.concatenate([hp, hj], axis=1) @ p["wo1"].T + p["bo1"])
    return jax.nn.sigmoid(hid @ p["wo2"].T + p["bo2"])


if __name__ == "__main__":
    B = 8
    predicate_feats = 16
    join_feats = 8
    hid_units = 32

    key = jax.random.PRNGKey(0)
    k_pred, k_join, k_params = jax.random.split(key, 3)

    predicates = jax.random.normal(k_pred, (B, predicate_feats), jnp.float32)
    joins = jax.random.normal(k_join, (B, join_feats), jnp.float32)
    params = init_params(k_params, predicate_feats, join_feats, hid_units)
    fused = prepare_fused_params(params)

    out = simple_mlp_forward(predicates, joins, fused)
    out = jax.block_until_ready(out)

    ref = reference_forward(predicates, joins, params)
    assert out.shape == (B, 1)
    # Remaining delta vs. the reference comes from MXU default-precision rounding of f32
    # operands (present in both the kernel and the XLA reference dots, just in different
    # orders); strictly less rounding than the previous bf16-weight version.
    max_err = jnp.max(jnp.abs(out - ref))
    assert jnp.allclose(out, ref, atol=2e-2, rtol=2e-2), f"mismatch vs reference: {max_err}"

    print("KERNEL_OK")
</pallas_src>

<mosaic_0001>
module attributes {stable_mosaic.version = 11 : i64} {
  func.func @simple_mlp_kernel(%arg0: i32, %arg1: memref<16x128xf32, #tpu.memory_space<vmem>>, %arg2: memref<8x128xf32, #tpu.memory_space<vmem>>, %arg3: memref<64x24xf32, #tpu.memory_space<vmem>>, %arg4: memref<64x1xf32, #tpu.memory_space<vmem>>, %arg5: memref<64x64xf32, #tpu.memory_space<vmem>>, %arg6: memref<64x1xf32, #tpu.memory_space<vmem>>, %arg7: memref<32x64xf32, #tpu.memory_space<vmem>>, %arg8: memref<32x1xf32, #tpu.memory_space<vmem>>, %arg9: memref<1x32xf32, #tpu.memory_space<vmem>>, %arg10: memref<1x1xf32, #tpu.memory_space<vmem>>, %arg11: memref<1x128xf32, #tpu.memory_space<vmem>>) attributes {dimension_semantics = [#tpu.dimension_semantics<parallel>], iteration_bounds = array<i64: 1>, scalar_prefetch = 0 : i64, scratch_operands = 0 : i64, tpu.core_type = #tpu.core_type<tc>, window_params = [{transform_indices = @transform_0, window_bounds = array<i64: 16, 128>}, {transform_indices = @transform_1, window_bounds = array<i64: 8, 128>}, {pipeline_mode = #tpu.pipeline_mode<synchronous>, transform_indices = @transform_2, window_bounds = array<i64: 64, 24>}, {pipeline_mode = #tpu.pipeline_mode<synchronous>, transform_indices = @transform_3, window_bounds = array<i64: 64, 1>}, {pipeline_mode = #tpu.pipeline_mode<synchronous>, transform_indices = @transform_4, window_bounds = array<i64: 64, 64>}, {pipeline_mode = #tpu.pipeline_mode<synchronous>, transform_indices = @transform_5, window_bounds = array<i64: 64, 1>}, {pipeline_mode = #tpu.pipeline_mode<synchronous>, transform_indices = @transform_6, window_bounds = array<i64: 32, 64>}, {pipeline_mode = #tpu.pipeline_mode<synchronous>, transform_indices = @transform_7, window_bounds = array<i64: 32, 1>}, {pipeline_mode = #tpu.pipeline_mode<synchronous>, transform_indices = @transform_8, window_bounds = array<i64: 1, 32>}, {pipeline_mode = #tpu.pipeline_mode<synchronous>, transform_indices = @transform_9, window_bounds = array<i64: 1, 1>}, {transform_indices = @transform_10, window_bounds = array<i64: 1, 128>}]} {
    %c0 = arith.constant 0 : index
    %c0_0 = arith.constant 0 : index
    %0 = vector.load %arg1[%c0, %c0_0] : memref<16x128xf32, #tpu.memory_space<vmem>>, vector<16x128xf32>
    %c0_1 = arith.constant 0 : index
    %c0_2 = arith.constant 0 : index
    %1 = vector.load %arg2[%c0_1, %c0_2] : memref<8x128xf32, #tpu.memory_space<vmem>>, vector<8x128xf32>
    %2 = tpu.concatenate %0, %1 in 0 : vector<16x128xf32>, vector<8x128xf32> -> vector<24x128xf32>
    %c0_3 = arith.constant 0 : index
    %c0_4 = arith.constant 0 : index
    %3 = vector.load %arg3[%c0_3, %c0_4] : memref<64x24xf32, #tpu.memory_space<vmem>>, vector<64x24xf32>
    %cst = arith.constant dense<0.000000e+00> : vector<64x128xf32>
    %4 = tpu.matmul %3, %2, %cst {dimension_numbers = #tpu.dot_dimension_numbers<[1], [0], [0], [1], [0, 0, 1, 1], [], []>} : vector<64x24xf32>, vector<24x128xf32>, vector<64x128xf32> -> vector<64x128xf32>
    %c0_5 = arith.constant 0 : index
    %c0_6 = arith.constant 0 : index
    %5 = vector.load %arg4[%c0_5, %c0_6] : memref<64x1xf32, #tpu.memory_space<vmem>>, vector<64x1xf32>
    %6 = vector.broadcast %5 : vector<64x1xf32> to vector<64x128xf32>
    %7 = arith.addf %4, %6 : vector<64x128xf32>
    %cst_7 = arith.constant 0.000000e+00 : f32
    %8 = vector.broadcast %cst_7 : f32 to vector<64x128xf32>
    %9 = arith.maximumf %7, %8 : vector<64x128xf32>
    %c0_8 = arith.constant 0 : index
    %c0_9 = arith.constant 0 : index
    %10 = vector.load %arg5[%c0_8, %c0_9] : memref<64x64xf32, #tpu.memory_space<vmem>>, vector<64x64xf32>
    %cst_10 = arith.constant dense<0.000000e+00> : vector<64x128xf32>
    %11 = tpu.matmul %10, %9, %cst_10 {dimension_numbers = #tpu.dot_dimension_numbers<[1], [0], [0], [1], [0, 0, 1, 1], [], []>} : vector<64x64xf32>, vector<64x128xf32>, vector<64x128xf32> -> vector<64x128xf32>
    %c0_11 = arith.constant 0 : index
    %c0_12 = arith.constant 0 : index
    %12 = vector.load %arg6[%c0_11, %c0_12] : memref<64x1xf32, #tpu.memory_space<vmem>>, vector<64x1xf32>
    %13 = vector.broadcast %12 : vector<64x1xf32> to vector<64x128xf32>
    %14 = arith.addf %11, %13 : vector<64x128xf32>
    %cst_13 = arith.constant 0.000000e+00 : f32
    %15 = vector.broadcast %cst_13 : f32 to vector<64x128xf32>
    %16 = arith.maximumf %14, %15 : vector<64x128xf32>
    %c0_14 = arith.constant 0 : index
    %c0_15 = arith.constant 0 : index
    %17 = vector.load %arg7[%c0_14, %c0_15] : memref<32x64xf32, #tpu.memory_space<vmem>>, vector<32x64xf32>
    %cst_16 = arith.constant dense<0.000000e+00> : vector<32x128xf32>
    %18 = tpu.matmul %17, %16, %cst_16 {dimension_numbers = #tpu.dot_dimension_numbers<[1], [0], [0], [1], [0, 0, 1, 1], [], []>} : vector<32x64xf32>, vector<64x128xf32>, vector<32x128xf32> -> vector<32x128xf32>
    %c0_17 = arith.constant 0 : index
    %c0_18 = arith.constant 0 : index
    %19 = vector.load %arg8[%c0_17, %c0_18] : memref<32x1xf32, #tpu.memory_space<vmem>>, vector<32x1xf32>
    %20 = vector.broadcast %19 : vector<32x1xf32> to vector<32x128xf32>
    %21 = arith.addf %18, %20 : vector<32x128xf32>
    %cst_19 = arith.constant 0.000000e+00 : f32
    %22 = vector.broadcast %cst_19 : f32 to vector<32x128xf32>
    %23 = arith.maximumf %21, %22 : vector<32x128xf32>
    %c0_20 = arith.constant 0 : index
    %c0_21 = arith.constant 0 : index
    %24 = vector.load %arg9[%c0_20, %c0_21] : memref<1x32xf32, #tpu.memory_space<vmem>>, vector<1x32xf32>
    %cst_22 = arith.constant dense<0.000000e+00> : vector<1x128xf32>
    %25 = tpu.matmul %24, %23, %cst_22 {dimension_numbers = #tpu.dot_dimension_numbers<[1], [0], [0], [1], [0, 0, 1, 1], [], []>} : vector<1x32xf32>, vector<32x128xf32>, vector<1x128xf32> -> vector<1x128xf32>
    %c0_23 = arith.constant 0 : index
    %c0_24 = arith.constant 0 : index
    %26 = vector.load %arg10[%c0_23, %c0_24] : memref<1x1xf32, #tpu.memory_space<vmem>>, vector<1x1xf32>
    %27 = vector.broadcast %26 : vector<1x1xf32> to vector<1x128xf32>
    %28 = arith.addf %25, %27 : vector<1x128xf32>
    %29 = arith.negf %28 : vector<1x128xf32>
    %30 = math.exp %29 : vector<1x128xf32>
    %cst_25 = arith.constant 1.000000e+00 : f32
    %31 = vector.broadcast %cst_25 : f32 to vector<1x128xf32>
    %32 = arith.addf %31, %30 : vector<1x128xf32>
    %33 = arith.divf %31, %32 : vector<1x128xf32>
    %c0_26 = arith.constant 0 : index
    %c0_27 = arith.constant 0 : index
    %34 = vector.load %arg11[%c0_26, %c0_27] : memref<1x128xf32, #tpu.memory_space<vmem>>, vector<1x128xf32>
    tpu.vector_store %arg11[%c0_26, %c0_27], %33 {strides = array<i32>} : memref<1x128xf32, #tpu.memory_space<vmem>>, vector<1x128xf32>,
    return
  }
  func.func @transform_0(%arg0: i32) -> (i32, i32) {
    %c0_i32 = arith.constant 0 : i32
    %c0_i32_0 = arith.constant 0 : i32
    return %c0_i32, %arg0 : i32, i32
  }
  func.func @transform_1(%arg0: i32) -> (i32, i32) {
    %c0_i32 = arith.constant 0 : i32
    %c0_i32_0 = arith.constant 0 : i32
    return %c0_i32, %arg0 : i32, i32
  }
  func.func @transform_2(%arg0: i32) -> (i32, i32) {
    %c0_i32 = arith.constant 0 : i32
    %c0_i32_0 = arith.constant 0 : i32
    %c0_i32_1 = arith.constant 0 : i32
    return %c0_i32, %c0_i32_0 : i32, i32
  }
  func.func @transform_3(%arg0: i32) -> (i32, i32) {
    %c0_i32 = arith.constant 0 : i32
    %c0_i32_0 = arith.constant 0 : i32
    %c0_i32_1 = arith.constant 0 : i32
    return %c0_i32, %c0_i32_0 : i32, i32
  }
  func.func @transform_4(%arg0: i32) -> (i32, i32) {
    %c0_i32 = arith.constant 0 : i32
    %c0_i32_0 = arith.constant 0 : i32
    %c0_i32_1 = arith.constant 0 : i32
    return %c0_i32, %c0_i32_0 : i32, i32
  }
  func.func @transform_5(%arg0: i32) -> (i32, i32) {
    %c0_i32 = arith.constant 0 : i32
    %c0_i32_0 = arith.constant 0 : i32
    %c0_i32_1 = arith.constant 0 : i32
    return %c0_i32, %c0_i32_0 : i32, i32
  }
  func.func @transform_6(%arg0: i32) -> (i32, i32) {
    %c0_i32 = arith.constant 0 : i32
    %c0_i32_0 = arith.constant 0 : i32
    %c0_i32_1 = arith.constant 0 : i32
    return %c0_i32, %c0_i32_0 : i32, i32
  }
  func.func @transform_7(%arg0: i32) -> (i32, i32) {
    %c0_i32 = arith.constant 0 : i32
    %c0_i32_0 = arith.constant 0 : i32
    %c0_i32_1 = arith.constant 0 : i32
    return %c0_i32, %c0_i32_0 : i32, i32
  }
  func.func @transform_8(%arg0: i32) -> (i32, i32) {
    %c0_i32 = arith.constant 0 : i32
    %c0_i32_0 = arith.constant 0 : i32
    %c0_i32_1 = arith.constant 0 : i32
    return %c0_i32, %c0_i32_0 : i32, i32
  }
  func.func @transform_9(%arg0: i32) -> (i32, i32) {
    %c0_i32 = arith.constant 0 : i32
    %c0_i32_0 = arith.constant 0 : i32
    %c0_i32_1 = arith.constant 0 : i32
    return %c0_i32, %c0_i32_0 : i32, i32
  }
  func.func @transform_10(%arg0: i32) -> (i32, i32) {
    %c0_i32 = arith.constant 0 : i32
    %c0_i32_0 = arith.constant 0 : i32
    return %c0_i32, %arg0 : i32, i32
  }
}

</mosaic_0001>

<bundles_post_ra>
// kernel: tpu_custom_call.1
= control target key start
LH: loop header
LB: loop body
LE: loop exit
PB: predicated region body
PF: predicated region fallthrough
CT: control target
= control target key end

     0   :  { %s1113_s0 = inlined_call_operand.vmem [shape: f32[16,128], index: 0, kind: input, shape index: {}]   ;;  %s1114_s1 = inlined_call_operand.vmem [shape: f32[8,128], index: 1, kind: input, shape index: {}]   ;;  %s1115_s2 = inlined_call_operand.vmem [shape: f32[64,24], index: 2, kind: input, shape index: {}]   ;;  %s1116_s3 = inlined_call_operand.vmem [shape: f32[64,1], index: 3, kind: input, shape index: {}]   ;;  %s1117_s4 = inlined_call_operand.vmem [shape: f32[64,64], index: 4, kind: input, shape index: {}]   ;;  %s1118_s5 = inlined_call_operand.vmem [shape: f32[64,1], index: 5, kind: input, shape index: {}]   ;;  %s1119_s6 = inlined_call_operand.vmem [shape: f32[32,64], index: 6, kind: input, shape index: {}]   ;;  %s1120_s7 = inlined_call_operand.vmem [shape: f32[32,1], index: 7, kind: input, shape index: {}]   ;;  %s1121_s8 = inlined_call_operand.vmem [shape: f32[1,32], index: 8, kind: input, shape index: {}]   ;;  %s1122_s9 = inlined_call_operand.<no memory space> [shape: f32[1,1], index: 9, kind: input, shape index: {}]   ;;  %s1123_s10 = inlined_call_operand.hbm [shape: f32[1,128], index: 10, kind: output, shape index: {}]  }
   0x1   :  { %v15_v0 = vstv %s1122_s9 }
   0x2   :  { %16 = vst [vmem:[#allocation2] sm:$0x1] %v15_v0 }
   0x3   :  { %v38_v1 = vld [vmem:[%s1113_s0] sm:$0xff]  ;;  %v39_v2 = vld [vmem:[%s1113_s0 + $0x8] sm:$0xff]  ;;  %vm97_vm0 = vcmask 195584   ;;  %v886_v5 = vmov 0   ;;  %v51_v8 = vld [vmem:[%s1116_s3 + $0x10] sm:$0xff] }
   0x4   :  { %v809_v3 = vpack.c.bf16 %v39_v2, %v38_v1  ;;  %v41_v4 = vld [vmem:[%s1115_s2] sm:$0xff]  ;;  %856 = vset.pattern.permute.xlu0 %v886_v5  ;;  %857 = vset.pattern.permute.xlu1 %v886_v5  ;;  %v50_v9 = vld [vmem:[%s1116_s3 + $0x8] sm:$0xff]  ;;  %v52_v11 = vld [vmem:[%s1116_s3 + $0x18] sm:$0xff] }
   0x5   :  { %v40_v6 = vld [vmem:[%s1114_s1] sm:$0xff]  ;;  %736 = vmatprep.mubr.msk.f32.mxu0 %vm97_vm0, %v41_v4  ;;  %69 = vperm.xlu1 %857, %v51_v8   ;;  %v42_v10 = vld [vmem:[%s1115_s2 + $0x8] sm:$0xff]  ;;  %v43_v12 = vld [vmem:[%s1115_s2 + $0x10] sm:$0xff] }
   0x6   :  { %810 = vmatprep.subr.bf16.mxu0 %v809_v3  ;;  %v49_v7 = vld [vmem:[%s1116_s3] sm:$0xff]  ;;  %v44_v14 = vld [vmem:[%s1115_s2 + $0x18] sm:$0xff]  ;;  %v54_v15 = vld [vmem:[%s1116_s3 + $0x28] sm:$0xff] }
   0x7   :  { %812 = vmatpush3.bf16.msra.mxu0 %v809_v3  ;;  %59 = vperm.xlu0 %856, %v49_v7   ;;  %v53_v13 = vld [vmem:[%s1116_s3 + $0x20] sm:$0xff] }
   0x8   :  { %734 = vmatprep.subr.mxu0 %v40_v6 }
   0x9   :  { %74 = vperm.xlu1 %857, %v52_v11  }
   0xb   :  { %735 = vmatpush3.msra.mxu0 %v40_v6  ;;  %64 = vperm.xlu0 %856, %v50_v9  }
   0xc   :  { %737 = vmatmul.mubr.msk.f32.vlgmr.msra.gmra.mrb[0].mxu0 %vm97_vm0, %v42_v10 }
   0xd   :  { %739 = vmatprep.mubr.msk.f32.mxu0 %vm97_vm0, %v43_v12 }
   0xe   :  { %17 = vsyncpa [#allocation4], 0  ;;  %v45_v16 = vld [vmem:[%s1115_s2 + $0x20] sm:$0xff]  ;;  %v55_v17 = vld [vmem:[%s1116_s3 + $0x30] sm:$0xff]  ;;  %84 = vperm.xlu1 %857, %v54_v15   ;;  %vm291_vm1 = vcmask 523264   ;;  %vm888_vm2 = vmmov 0  }
   0xf   :  { %79 = vperm.xlu0 %856, %v53_v13   ;;  %v46_v18 = vld [vmem:[%s1115_s2 + $0x28] sm:$0xff]  ;;  %v56_v19 = vld [vmem:[%s1116_s3 + $0x38] sm:$0xff]  ;;  %v47_v20 = vld [vmem:[%s1115_s2 + $0x30] sm:$0xff]  ;;  %vm569_vm3 = vcmask 261120   ;;  %s890_s24 = smov [#allocation3]  }
  0x10   :  { %740 = vmatmul.mubr.msk.f32.gmra.mrb[2].mxu0 %vm97_vm0, %v44_v14  ;;  %v243_v21 = vld [vmem:[%s1118_s5] sm:$0xff]  ;;  %v48_v22 = vld [vmem:[%s1115_s2 + $0x38] sm:$0xff]  ;;  %v244_v23 = vld [vmem:[%s1118_s5 + $0x8] sm:$0xff]  ;;  %s656_s25 = sshll.u32 %s890_s24, 4  ;;  %s657_s25 = int_to_ptr.vmem [resolvable:$true] %s656_s25 }
  0x11   :  { %742 = vmatprep.mubr.msk.f32.mxu0 %vm97_vm0, %v45_v16  ;;  %v245_v24 = vld [vmem:[%s1118_s5 + $0x10] sm:$0xff]  ;;  %v246_v25 = vld [vmem:[%s1118_s5 + $0x18] sm:$0xff]  ;;  %v247_v26 = vld [vmem:[%s1118_s5 + $0x20] sm:$0xff]  ;;  %s866_s26 = scalar_lea.vmem %s657_s25, 32  ;;  %p867_p1 = scmp.lt.s32.totalorder %s657_s25, %s657_s25 }
  0x12   :  { %94 = vperm.xlu1 %857, %v56_v19   ;;  %v248_v27 = vld [vmem:[%s1118_s5 + $0x28] sm:$0xff]  ;;  %v249_v28 = vld [vmem:[%s1118_s5 + $0x30] sm:$0xff]  ;;  %v250_v29 = vld [vmem:[%s1118_s5 + $0x38] sm:$0xff] }
  0x13   :  { %89 = vperm.xlu0 %856, %v55_v17   ;;  %v433_v30 = vld [vmem:[%s1120_s7] sm:$0xff]  ;;  %v434_v31 = vld [vmem:[%s1120_s7 + $0x8] sm:$0xff]  ;;  %v435_v32 = vld [vmem:[%s1120_s7 + $0x10] sm:$0xff] }
  0x14   :  { %743 = vmatmul.mubr.msk.f32.gmra.mrb[4].mxu0 %vm97_vm0, %v46_v18  ;;  %v436_v33 = vld [vmem:[%s1120_s7 + $0x18] sm:$0xff]  ;;  %v559_v34 = vld [vmem:[#allocation2] sm:$0x1]  ;;  %v236_v8 = vld [vmem:[%s1117_s4 + $0x8] sm:$0xff] }
  0x15   :  { %745 = vmatprep.mubr.msk.f32.mxu0 %vm97_vm0, %v47_v20  ;;  %v235_v35 = vld [vmem:[%s1117_s4] sm:$0xff]  ;;  %v237_v9 = vld [vmem:[%s1117_s4 + $0x10] sm:$0xff]  ;;  %v238_v10 = vld [vmem:[%s1117_s4 + $0x18] sm:$0xff] }
  0x16   :  { %258 = vperm.xlu1 %857, %v244_v23   ;;  %764 = vmatprep.mubr.msk.f32.mxu1 %vm291_vm1, %v235_v35  ;;  %v239_v11 = vld [vmem:[%s1117_s4 + $0x20] sm:$0xff]  ;;  %v240_v12 = vld [vmem:[%s1117_s4 + $0x28] sm:$0xff]  ;;  %v241_v13 = vld [vmem:[%s1117_s4 + $0x30] sm:$0xff] }
  0x17   :  { %253 = vperm.xlu0 %856, %v243_v21   ;;  %v242_v14 = vld [vmem:[%s1117_s4 + $0x38] sm:$0xff]  ;;  %v429_v15 = vld [vmem:[%s1119_s6] sm:$0xff] }
  0x18   :  { %746 = vmatmul.mubr.msk.f32.gmra.mrb[6].mxu0 %vm97_vm0, %v48_v22 }
  0x19   :  { %792 = vmatprep.mubr.msk.f32.mxu0 %vm291_vm1, %v429_v15 }
  0x1a   :  { %268 = vperm.xlu1 %857, %v246_v25  }
  0x1b   :  { %263 = vperm.xlu0 %856, %v245_v24  }
  0x1e   :  { %278 = vperm.xlu1 %857, %v248_v27  }
  0x1f   :  { %273 = vperm.xlu0 %856, %v247_v26  }
  0x22   :  { %288 = vperm.xlu1 %857, %v250_v29  }
  0x23   :  { %283 = vperm.xlu0 %856, %v249_v28  }
  0x26   :  { %444 = vperm.xlu1 %857, %v434_v31  }
  0x27   :  { %439 = vperm.xlu0 %856, %v433_v30  }
  0x2a   :  { %454 = vperm.xlu1 %857, %v436_v33  }
  0x2b   :  { %449 = vperm.xlu0 %856, %v435_v32  }
  0x2f   :  { %562 = vperm.xlu0 %856, %v559_v34  }
  0x84   :  { %v70_v37 = vpop.permute.xlu1 %69 }
  0x86   :  { %v60_v36 = vpop.permute.xlu0 %59 }
  0x88   :  { %v75_v39 = vpop.permute.xlu1 %74 }
  0x8a   :  { %v65_v38 = vpop.permute.xlu0 %64 }
  0x8d   :  { %v85_v49 = vpop.permute.xlu1 %84 }
  0x8e   :  { %v80_v52 = vpop.permute.xlu0 %79 }
  0x91   :  { %v95_v61 = vpop.permute.xlu1 %94 }
  0x92   :  { %v90_v0 = vpop.permute.xlu0 %89 }
  0x95   :  { %v259_v16 = vpop.permute.xlu1 %258 }
  0x96   :  { %v254_v17 = vpop.permute.xlu0 %253 }
  0x99   :  { %v269_v18 = vpop.permute.xlu1 %268 }
  0x9a   :  { %v264_v20 = vpop.permute.xlu0 %263 }
  0x9d   :  { %v279_v29 = vpop.permute.xlu1 %278 }
  0x9e   :  { %v274_v32 = vpop.permute.xlu0 %273 }
  0xdf   :  { %v738_v40 = vpop.f32.mrb[0].mxu0 }
  0xe0   :  { %v194_v41 = vadd.f32 %v738_v40, %v65_v38  ;;  %v188_v42 = vpop.f32.mrb[1].mxu0 }
  0xe1   :  { %v189_v43 = vadd.f32 %v188_v42, %v60_v36 }
  0xe2   :  { %v228_v44 = vmax.f32 %v194_v41, 0.0  ;;  %v289_v41 = vpop.permute.xlu1 %288 }
  0xe3   :  { %v227_v45 = vmax.f32 %v189_v43, 0.0  ;;  %v741_v46 = vpop.f32.mrb[2].mxu0 }
  0xe4   :  { %v204_v47 = vadd.f32 %v741_v46, %v75_v39  ;;  %v198_v48 = vpop.f32.mrb[3].mxu0 }
  0xe5   :  { %v199_v50 = vadd.f32 %v198_v48, %v70_v37  ;;  %v813_v51 = vpack.c.bf16 %v228_v44, %v227_v45  ;;  %v284_v44 = vpop.permute.xlu0 %283 }
  0xe6   :  { %v230_v53 = vmax.f32 %v204_v47, 0.0 }
  0xe7   :  { %v229_v54 = vmax.f32 %v199_v50, 0.0  ;;  %v744_v55 = vpop.f32.mrb[4].mxu0  ;;  %814 = vmatprep.subr.bf16.mxu1 %v813_v51 }
  0xe8   :  { %v214_v56 = vadd.f32 %v744_v55, %v85_v49  ;;  %v208_v57 = vpop.f32.mrb[5].mxu0  ;;  %816 = vmatpush3.bf16.msra.mxu1 %v813_v51  ;;  %v887_v55 = vmov 0.0|0.0  }
  0xe9   :  { %v817_v58 = vpack.c.bf16 %v230_v53, %v229_v54  ;;  %v209_v59 = vadd.f32 %v208_v57, %v80_v52  ;;  %v430_v52 = vld [vmem:[%s1119_s6 + $0x8] sm:$0xff]  ;;  %v431_v53 = vld [vmem:[%s1119_s6 + $0x10] sm:$0xff]  ;;  %v432_v54 = vld [vmem:[%s1119_s6 + $0x18] sm:$0xff]  ;;  %v445_v57 = vpop.permute.xlu1 %444 }
  0xea   :  { %v232_v60 = vmax.f32 %v214_v56, 0.0  ;;  %v889_v56 = vmov 0.0  }
  0xeb   :  { %v231_v62 = vmax.f32 %v209_v59, 0.0  ;;  %v747_v63 = vpop.f32.mrb[6].mxu0  ;;  %818 = vmatprep.subr.bf16.mxu1 %v817_v58 }
  0xec   :  { %v224_v1 = vadd.f32 %v747_v63, %v95_v61  ;;  %v218_v2 = vpop.f32.mrb[7].mxu0  ;;  %820 = vmatpush3.bf16.msra.mxu1 %v817_v58  ;;  %v440_v58 = vpop.permute.xlu0 %439 }
  0xed   :  { %v821_v3 = vpack.c.bf16 %v232_v60, %v231_v62  ;;  %v219_v4 = vadd.f32 %v218_v2, %v90_v0  ;;  %v455_v0 = vpop.permute.xlu1 %454 }
  0xee   :  { %v234_v5 = vmax.f32 %v224_v1, 0.0 }
  0xef   :  { %v233_v6 = vmax.f32 %v219_v4, 0.0  ;;  %822 = vmatprep.subr.bf16.mxu1 %v821_v3 }
  0xf0   :  { %824 = vmatpush3.bf16.msra.mxu1 %v821_v3  ;;  %v450_v3 = vpop.permute.xlu0 %449 }
  0xf1   :  { %v825_v7 = vpack.c.bf16 %v234_v5, %v233_v6 }
  0xf3   :  { %826 = vmatprep.subr.bf16.mxu1 %v825_v7 }
  0xf4   :  { %828 = vmatpush3.bf16.msra.mxu1 %v825_v7  ;;  %v563_v15 = vpop.permute.xlu0 %562 }
  0xf7   :  { %765 = vmatmul.mubr.msk.f32.vlgmr.msra.gmra.mrb[0].mxu1 %vm291_vm1, %v236_v8 }
  0xf8   :  { %767 = vmatprep.mubr.msk.f32.mxu1 %vm291_vm1, %v237_v9 }
  0xfb   :  { %768 = vmatmul.mubr.msk.f32.gmra.mrb[2].mxu1 %vm291_vm1, %v238_v10 }
  0xfc   :  { %770 = vmatprep.mubr.msk.f32.mxu1 %vm291_vm1, %v239_v11  ;;  %v558_v11 = vld [vmem:[%s1121_s8] sm:$0x1]  ;;  %s862_s8 = scalar_lea.vmem %s657_s25, 16 }
  0xfd   :  { %p863_p0 = scmp.ne.s32.totalorder %s657_s25, %s862_s8  ;;  %p868_p2 = scmp.lt.s32.totalorder %s866_s26, %s862_s8 }
  0xff   :  { %771 = vmatmul.mubr.msk.f32.gmra.mrb[4].mxu1 %vm291_vm1, %v240_v12  ;;  %v565_v12 = vlaneseq  ;;  %p869_p3 = por %p868_p2, %p867_p1 }
 0x100   :  { %773 = vmatprep.mubr.msk.f32.mxu1 %vm291_vm1, %v241_v13 }
 0x101   :  { %v566_v13 = vshrl.u32 %v565_v12, 7  ;;  %p870_p4 = pnand %p869_p3, %p863_p0 }
 0x103   :  { %774 = vmatmul.mubr.msk.f32.gmra.mrb[6].mxu1 %vm291_vm1, %v242_v14  ;;  %v567_v14 = vsub.s32 0, %v566_v13 }
 0x1ca   :  { %v766_v19 = vpop.f32.mrb[0].mxu1 }
 0x1cb   :  { %v388_v21 = vadd.f32 %v766_v19, %v259_v16  ;;  %v382_v22 = vpop.f32.mrb[1].mxu1  ;;  %v568_v16 = vrot.slane %v563_v15, %v567_v14 }
 0x1cc   :  { %v383_v23 = vadd.f32 %v382_v22, %v254_v17 }
 0x1cd   :  { %v422_v24 = vmax.f32 %v388_v21, 0.0 }
 0x1ce   :  { %v421_v25 = vmax.f32 %v383_v23, 0.0  ;;  %v769_v26 = vpop.f32.mrb[2].mxu1 }
 0x1cf   :  { %v398_v27 = vadd.f32 %v769_v26, %v269_v18  ;;  %v392_v28 = vpop.f32.mrb[3].mxu1 }
 0x1d0   :  { %v829_v30 = vpack.c.bf16 %v422_v24, %v421_v25  ;;  %v393_v31 = vadd.f32 %v392_v28, %v264_v20 }
 0x1d1   :  { %v424_v33 = vmax.f32 %v398_v27, 0.0 }
 0x1d2   :  { %v423_v34 = vmax.f32 %v393_v31, 0.0  ;;  %v772_v35 = vpop.f32.mrb[4].mxu1  ;;  %830 = vmatprep.subr.bf16.mxu0 %v829_v30 }
 0x1d3   :  { %v408_v36 = vadd.f32 %v772_v35, %v279_v29  ;;  %v402_v37 = vpop.f32.mrb[5].mxu1  ;;  %832 = vmatpush3.bf16.msra.mxu0 %v829_v30 }
 0x1d4   :  { %v833_v38 = vpack.c.bf16 %v424_v33, %v423_v34  ;;  %v403_v39 = vadd.f32 %v402_v37, %v274_v32 }
 0x1d5   :  { %v426_v40 = vmax.f32 %v408_v36, 0.0 }
 0x1d6   :  { %v425_v42 = vmax.f32 %v403_v39, 0.0  ;;  %v775_v43 = vpop.f32.mrb[6].mxu1  ;;  %834 = vmatprep.subr.bf16.mxu0 %v833_v38 }
 0x1d7   :  { %v418_v45 = vadd.f32 %v775_v43, %v289_v41  ;;  %v412_v46 = vpop.f32.mrb[7].mxu1  ;;  %836 = vmatpush3.bf16.msra.mxu0 %v833_v38 }
 0x1d8   :  { %v837_v47 = vpack.c.bf16 %v426_v40, %v425_v42  ;;  %v413_v48 = vadd.f32 %v412_v46, %v284_v44 }
 0x1d9   :  { %v428_v49 = vmax.f32 %v418_v45, 0.0 }
 0x1da   :  { %v427_v50 = vmax.f32 %v413_v48, 0.0  ;;  %838 = vmatprep.subr.bf16.mxu0 %v837_v47 }
 0x1db   :  { %840 = vmatpush3.bf16.msra.mxu0 %v837_v47 }
 0x1dc   :  { %v841_v51 = vpack.c.bf16 %v428_v49, %v427_v50 }
 0x1de   :  { %842 = vmatprep.subr.bf16.mxu0 %v841_v51 }
 0x1df   :  { %844 = vmatpush3.bf16.msra.mxu0 %v841_v51 }
 0x1e0   :  { %845 = vmatprep.subr.bf16.mxu0 %v887_v55 }
 0x1e2   :  { %793 = vmatmul.mubr.msk.f32.vlgmr.msra.gmra.mrb[8].mxu0 %vm291_vm1, %v430_v52 }
 0x1e3   :  { %795 = vmatprep.mubr.msk.f32.mxu0 %vm291_vm1, %v431_v53 }
 0x1e6   :  { %796 = vmatmul.mubr.msk.f32.gmra.mrb[10].mxu0 %vm291_vm1, %v432_v54 }
 0x1e7   :  { %806 = vmatprep.mubr.msk.f32.mxu0 %vm888_vm2, %v889_v56 }
 0x2b5   :  { %v794_v59 = vpop.f32.mrb[8].mxu0 }
 0x2b6   :  { %v541_v60 = vadd.f32 %v794_v59, %v445_v57  ;;  %v535_v61 = vpop.f32.mrb[9].mxu0 }
 0x2b7   :  { %v536_v62 = vadd.f32 %v535_v61, %v440_v58 }
 0x2b8   :  { %v555_v63 = vmax.f32 %v541_v60, 0.0 }
 0x2b9   :  { %v554_v1 = vmax.f32 %v536_v62, 0.0  ;;  %v797_v2 = vpop.f32.mrb[10].mxu0 }
 0x2ba   :  { %v551_v4 = vadd.f32 %v797_v2, %v455_v0  ;;  %v545_v5 = vpop.f32.mrb[11].mxu0 }
 0x2bb   :  { %v846_v6 = vpack.c.bf16 %v555_v63, %v554_v1  ;;  %v546_v7 = vadd.f32 %v545_v5, %v450_v3 }
 0x2bc   :  { %v557_v8 = vmax.f32 %v551_v4, 0.0 }
 0x2bd   :  { %v556_v9 = vmax.f32 %v546_v7, 0.0  ;;  %847 = vmatpush3.bf16.msra.mxu0 %v846_v6 }
 0x2be   :  { %848 = vmatprep.subr.bf16.mxu0 %v887_v55 }
 0x2bf   :  { %v849_v10 = vpack.c.bf16 %v557_v8, %v556_v9 }
 0x2c1   :  { %850 = vmatpush3.bf16.msra.mxu0 %v849_v10 }
 0x2c4   :  { %807 = vmatmul.mubr.msk.f32.vlgmr.msra.gmra.mrb[12].mxu0 %vm569_vm3, %v558_v11 }
 0x397   :  { %v639_v17 = vpop.f32.mrb[12].mxu0 }
 0x398   :  { %v640_v18 = vadd.f32 %v639_v17, %v568_v16  ;;  %v808_v19 = vpop.f32.mrb[13].mxu0 }
 0x39a   :  { %v685_v20 = vmul.f32 -1.442695, %v640_v18 }
 0x39c   :  { %858 = vpow2.f32 %v685_v20 }
 0x3a6   :  { %v859_v21 = vpop.eup %858 }
 0x3a7   :  { %v646_v22 = vadd.f32 1.0, %v859_v21 }
 0x3a9   :  { %860 = vrcp.f32 %v646_v22 }
 0x3b3   :  { %v861_v23 = vpop.eup %860 }
 0x3b4   :  { %649 = vst [vmem:[#allocation3] sm:$0x1] %v861_v23 }
 0x3b5   :  { %873 = shalt.err (!%p870_p4)
}
 0x3b6   :  { %s874_s7 = scalar_lea.hbm %s1123_s10, 16 }
 0x3b7   :  { %p875_p5 = scmp.ne.s32.totalorder %s1123_s10, %s874_s7  ;;  %p878_p6 = scmp.lt.u32.totalorder %s874_s7, %s1123_s10 }
 0x3b9   :  { %p880_p7 = pnand %p878_p6, %p875_p5 }
 0x3bb   :  { %883 = shalt.err (!%p880_p7)
}
 0x3bc   :  { %659 = dma.vmem_to_hbm [thread:$0]  %s657_s25, 16, %s1123_s10, [#allocation4]  }
 0x3bd   :  { %884 = dma.done.wait [#allocation4], 16  }
 0x3be   :  { %885 = vsyncadd [#allocation4], 4294967280 }
 0x3bf   :  { %663 = vsyncpa [#allocation4], 1 }

</bundles_post_ra>
